<compile_context>
chip_gen: v7x
topology: tpu7x:2x2x1
jax: 0.10.0
libtpu: 0.0.40
codegen_flags: <defaults>
</compile_context>

<pallas_src>
import math

import jax
import jax.numpy as jnp
from jax.experimental import pallas as pl
from jax.experimental.pallas import tpu as pltpu


def _rmsnorm_kernel(x_ref, g_ref, o_ref):
    # x_ref: (n_tile, C, hw_tile), g_ref: (1, C, 1) (already scaled by sqrt(C)),
    # o_ref: (n_tile, C, hw_tile)
    x = x_ref[...].astype(jnp.float32)
    g = g_ref[...]                                       # f32, broadcasts over n / lanes
    # Sum of squares over the channel (sublane) axis -> (n_tile, 1, hw_tile).
    sumsq = jnp.sum(x * x, axis=1, keepdims=True)
    # max(sqrt(s), 1e-12) == sqrt(max(s, 1e-24)); rsqrt goes to the EUP.
    inv = jax.lax.rsqrt(jnp.maximum(sumsq, jnp.float32(1e-24)))
    o_ref[...] = (x * inv * g).astype(o_ref.dtype)


def _default_budgets():
    """(target block bytes, scoped VMEM limit) sized per TPU generation.

    v5e/v6e: 128 MiB VMEM/core -> ~8 MiB blocks, 96 MiB scoped limit.
    v7x:      64 MiB VMEM/core -> ~4 MiB blocks, 48 MiB scoped limit
    (leaves room for double-buffered in/out tiles plus the f32 upcast scratch
    when the input is bf16).
    """
    vmem_bytes = 64 << 20                                # conservative fallback
    try:
        vmem_bytes = int(
            getattr(pltpu.get_tpu_info(), "vmem_capacity_bytes", vmem_bytes)
        )
    except Exception:
        pass
    if vmem_bytes >= (96 << 20):
        return 8 << 20, 96 << 20
    return 4 << 20, 48 << 20


def _pick_tiles(n, c, hw, itemsize, target_bytes):
    """Pick (n_tile, hw_tile) so one block is ~target_bytes and >= 2 blocks exist."""
    row_bytes = c * itemsize                             # one lane column, all channels

    if hw * row_bytes <= target_bytes:
        # Whole spatial extent of one image fits: keep the lane axis maximally
        # dense and batch images (N-tile) up to the byte budget.
        hw_tile = hw
        n_tile = int(max(1, min(n, target_bytes // max(1, hw * row_bytes))))
    else:
        n_tile = 1
        if hw < 128:
            # Cannot split below one lane tile; take the full (ragged) extent.
            # NOTE: with a huge C this block can exceed the byte budget — the
            # reduction axis (C) is not tiled here.
            hw_tile = hw
        else:
            hw_aligned = (hw // 128) * 128
            cand = (target_bytes // row_bytes) // 128 * 128
            # Lane floor: longer contiguous HBM runs per strided channel row
            # (matters most for bf16 / large C), never exceeding the byte
            # target via the floor alone.
            floor = 128
            for f in (512, 256):
                if f * row_bytes <= target_bytes:
                    floor = f
                    break
            hw_tile = int(min(hw_aligned, max(floor, cand)))

    # v7x megacore: guarantee >= 2 blocks so both TensorCores (and the DMA
    # pipeline) have work.  Prefer splitting N, then HW.
    if pl.cdiv(n, n_tile) * pl.cdiv(hw, hw_tile) < 2:
        if n >= 2:
            n_tile = (n + 1) // 2
        elif hw >= 256:
            hw_tile = ((hw + 1) // 2 + 127) // 128 * 128
    return n_tile, hw_tile


def rms_norm(x, g, *, target_tile_bytes=None, vmem_limit_bytes=None):
    """x: (N, C, H, W) NCHW, g: (1, C, 1, 1). Returns (N, C, H, W)."""
    n, c, h, w = x.shape
    hw = h * w

    default_target, default_limit = _default_budgets()
    if target_tile_bytes is None:
        target_tile_bytes = default_target
    if vmem_limit_bytes is None:
        vmem_limit_bytes = default_limit

    # Free reshapes: NCHW -> (N, C, H*W); g -> (1, C, 1) with sqrt(C) folded in.
    x3 = x.reshape(n, c, hw)
    g3 = g.reshape(1, c, 1).astype(jnp.float32) * jnp.float32(math.sqrt(c))

    itemsize = jnp.dtype(x.dtype).itemsize
    n_tile, hw_tile = _pick_tiles(n, c, hw, itemsize, target_tile_bytes)
    grid = (pl.cdiv(n, n_tile), pl.cdiv(hw, hw_tile))

    out3 = pl.pallas_call(
        _rmsnorm_kernel,
        out_shape=jax.ShapeDtypeStruct((n, c, hw), x.dtype),
        grid_spec=pltpu.PrefetchScalarGridSpec(
            num_scalar_prefetch=0,
            grid=grid,
            in_specs=[
                pl.BlockSpec((n_tile, c, hw_tile), lambda i, j: (i, 0, j)),
                pl.BlockSpec((1, c, 1), lambda i, j: (0, 0, 0)),
            ],
            out_specs=pl.BlockSpec((n_tile, c, hw_tile), lambda i, j: (i, 0, j)),
        ),
        compiler_params=pltpu.CompilerParams(
            # Both grid axes are fully independent -> shard across TCs on v7x.
            dimension_semantics=("parallel", "parallel"),
            vmem_limit_bytes=vmem_limit_bytes,
        ),
    )(x3, g3)

    return out3.reshape(n, c, h, w)


def _reference(x, g):
    xf = x.astype(jnp.float32)
    norm = jnp.maximum(
        jnp.sqrt(jnp.sum(jnp.square(xf), axis=1, keepdims=True)), 1e-12
    )
    c = x.shape[1]
    return (xf / norm) * g.astype(jnp.float32) * math.sqrt(c)


if __name__ == "__main__":
    key = jax.random.PRNGKey(0)
    n, c, h, w = 2, 4, 16, 16
    x = jax.random.normal(key, (n, c, h, w), dtype=jnp.float32)
    # Parameter init mirrors the PyTorch module: g = ones((1, C, 1, 1)).
    g = jnp.ones((1, c, 1, 1), dtype=jnp.float32)

    # f32 path.
    out = jax.block_until_ready(rms_norm(x, g))
    ref = _reference(x, g)
    assert out.shape == (n, c, h, w)
    assert jnp.allclose(out, ref.astype(out.dtype), atol=1e-5, rtol=1e-5)

    # bf16 path (exercises the in-kernel upcast + rounding).
    xb = x.astype(jnp.bfloat16)
    outb = jax.block_until_ready(rms_norm(xb, g))
    refb = _reference(xb, g)
    assert outb.dtype == jnp.bfloat16
    assert jnp.allclose(
        outb.astype(jnp.float32), refb, atol=3e-2, rtol=3e-2
    )

    print("KERNEL_OK")
</pallas_src>

<mosaic_0001>
module attributes {stable_mosaic.version = 11 : i64} {
  func.func @_rmsnorm_kernel(%arg0: i32, %arg1: i32, %arg2: memref<1x4x256xf32, #tpu.memory_space<vmem>>, %arg3: memref<1x4x1xf32, #tpu.memory_space<vmem>>, %arg4: memref<1x4x256xf32, #tpu.memory_space<vmem>>) attributes {dimension_semantics = [#tpu.dimension_semantics<parallel>, #tpu.dimension_semantics<parallel>], iteration_bounds = array<i64: 2, 1>, scalar_prefetch = 0 : i64, scratch_operands = 0 : i64, tpu.core_type = #tpu.core_type<tc>, window_params = [{transform_indices = @transform_0, window_bounds = array<i64: 1, 4, 256>}, {pipeline_mode = #tpu.pipeline_mode<synchronous>, transform_indices = @transform_1, window_bounds = array<i64: 1, 4, 1>}, {transform_indices = @transform_2, window_bounds = array<i64: 1, 4, 256>}]} {
    %c0 = arith.constant 0 : index
    %c0_0 = arith.constant 0 : index
    %c0_1 = arith.constant 0 : index
    %0 = vector.load %arg2[%c0, %c0_0, %c0_1] : memref<1x4x256xf32, #tpu.memory_space<vmem>>, vector<1x4x256xf32>
    %c0_2 = arith.constant 0 : index
    %c0_3 = arith.constant 0 : index
    %c0_4 = arith.constant 0 : index
    %1 = vector.load %arg3[%c0_2, %c0_3, %c0_4] : memref<1x4x1xf32, #tpu.memory_space<vmem>>, vector<1x4x1xf32>
    %2 = arith.mulf %0, %0 : vector<1x4x256xf32>
    %cst = arith.constant dense<0.000000e+00> : vector<1x256xf32>
    %3 = vector.multi_reduction <add>, %2, %cst [1] : vector<1x4x256xf32> to vector<1x256xf32>
    %4 = vector.shape_cast %3 : vector<1x256xf32> to vector<1x1x256xf32>
    %cst_5 = arith.constant 1.000000e-24 : f32
    %5 = vector.broadcast %cst_5 : f32 to vector<1x1x256xf32>
    %6 = arith.maximumf %4, %5 : vector<1x1x256xf32>
    %7 = math.rsqrt %6 : vector<1x1x256xf32>
    %8 = vector.broadcast %7 : vector<1x1x256xf32> to vector<1x4x256xf32>
    %9 = arith.mulf %0, %8 : vector<1x4x256xf32>
    %10 = vector.broadcast %1 : vector<1x4x1xf32> to vector<1x4x256xf32>
    %11 = arith.mulf %9, %10 : vector<1x4x256xf32>
    %c0_6 = arith.constant 0 : index
    %c0_7 = arith.constant 0 : index
    %c0_8 = arith.constant 0 : index
    %12 = vector.load %arg4[%c0_6, %c0_7, %c0_8] : memref<1x4x256xf32, #tpu.memory_space<vmem>>, vector<1x4x256xf32>
    tpu.vector_store %arg4[%c0_6, %c0_7, %c0_8], %11 {strides = array<i32>} : memref<1x4x256xf32, #tpu.memory_space<vmem>>, vector<1x4x256xf32>,
    return
  }
  func.func @transform_0(%arg0: i32, %arg1: i32) -> (i32, i32, i32) {
    %c0_i32 = arith.constant 0 : i32
    %c0_i32_0 = arith.constant 0 : i32
    return %arg0, %c0_i32, %arg1 : i32, i32, i32
  }
  func.func @transform_1(%arg0: i32, %arg1: i32) -> (i32, i32, i32) {
    %c0_i32 = arith.constant 0 : i32
    %c0_i32_0 = arith.constant 0 : i32
    %c0_i32_1 = arith.constant 0 : i32
    %c0_i32_2 = arith.constant 0 : i32
    return %c0_i32, %c0_i32_0, %c0_i32_1 : i32, i32, i32
  }
  func.func @transform_2(%arg0: i32, %arg1: i32) -> (i32, i32, i32) {
    %c0_i32 = arith.constant 0 : i32
    %c0_i32_0 = arith.constant 0 : i32
    return %arg0, %c0_i32, %arg1 : i32, i32, i32
  }
}

</mosaic_0001>

<bundles_post_ra>
// kernel: tpu_custom_call.1
= control target key start
LH: loop header
LB: loop body
LE: loop exit
PB: predicated region body
PF: predicated region fallthrough
CT: control target
= control target key end

     0   :  { %7 = vsyncpa [#allocation3], 0  ;;  %s723_s0 = inlined_call_operand.hbm [shape: f32[2,4,256], index: 0, kind: input, shape index: {}]   ;;  %s724_s1 = inlined_call_operand.vmem [shape: f32[1,4,1], index: 1, kind: input, shape index: {}]   ;;  %s725_s2 = inlined_call_operand.hbm [shape: f32[2,4,256], index: 2, kind: output, shape index: {}]  }
   0x1   :  { %9 = vsyncpa [#allocation3 + $0x1], 0 }
   0x2   :  { %10 = vsyncpa [#allocation4], 0 }
   0x3   :  { %12 = vsyncpa [#allocation4 + $0x1], 0  ;;  %s544_s9 = smov 0   ;;  %s546_s10 = smov 0  }
   0x4   :  { %s548_s11 = smov 0   ;;  %s550_s12 = smov 0  }
   0x5   :  { %s552_s13 = smov 0   ;;  %s554_s14 = smov 0  }
   0x6 LB: > { %s325_s15 = sadd.s32 4294967295, %s523_s14   ;;  %s326_s16 = sadd.s32 4294967294, %s523_s14   ;;  %s523_s14 = sphi %s554_s14, %s18_s14   ;;  %s519_s13 = sphi %s552_s13, %s741_s13   ;;  %s515_s12 = sphi %s550_s12, %s740_s12   ;;  %s511_s11 = sphi %s548_s11, %s739_s11   ;;  %s507_s10 = sphi %s546_s10, %s738_s10   ;;  %s503_s9 = sphi %s544_s9, %s737_s9  }
   0x7   : > { %s30_s17 = sadd.s32 1, %s519_s13  ;;  %s39_s18 = sadd.s32 1, %s511_s11 }
   0x8   : > { %p32_p0 = scmp.ge.s32.totalorder %s30_s17, 2  ;;  %p46_p1 = scmp.ne.s32.totalorder %s511_s11, %s507_s10 }
   0x9   : > { %p47_p2 = scmp.eq.s32.totalorder %s523_s14, 0  ;;  %p52_p3 = scmp.ne.s32.totalorder %s507_s10, %s503_s9 }
   0xa   : > { %s743_s17 = smov (%p32_p0, %s30_s17), 0  ;;  %p53_p5 = scmp.eq.s32.totalorder %s325_s15, 0 }
   0xb   : > { %p585_p4 = por %p47_p2, %p46_p1  ;;  %s34_s20 = ssub.s32 %s519_s13, %s743_s17 }
   0xc   : > { %p99_p6 = scmp.eq.s32.totalorder %s325_s15, 1  ;;  %p37_p7 = scmp.eq.s32.totalorder %s34_s20, 0 }
   0xd   : > { %p591_p8 = por %p53_p5, %p52_p3  ;;  %p105_p10 = scmp.eq.s32.totalorder %s326_s16, 1 }
   0xe   : > { %p595_p9 = por %p99_p6, %p46_p1  ;;  %p354_p13 = scmp.lt.s32.totalorder %s523_s14, 2 }
   0xf   : > { %s600_s23 = scalar_select %p37_p7, %s511_s11, %s39_s18  }
  0x10   : > { %s729_s22 = scalar_select %p595_p9, 1, 0 }
  0x11   : > { %p602_p11 = por %p105_p10, %p52_p3  ;;  %s128_s25 = sand.u32 1, %s511_s11  }
  0x12   : > { %s329_s26 = sshll.u32 %s128_s25, 3  ;;  %s340_s27 = sshll.u32 %s519_s13, 7 }
  0x13   : > { %s730_s24 = scalar_select %p602_p11, 1, 0 }
  0x14   : > { %s613_s30 = scalar_lea.hbm %s723_s0, %s340_s27  ;;  %s132_s3 = scalar_lea.vmem [#allocation2], %s329_s26 }
  0x15   : > { %s142_s4 = sshll.u32 %s132_s3, 4  ;;  %p619_p0 = pnand %p354_p13, %p585_p4  ;;  %s615_s4 = int_to_ptr.vmem [resolvable:$true] %s142_s4 }
  0x16   : > { %s129_s6 = scalar_lea.sflag [#allocation3], %s128_s25  ;;  %s411_s7 = scalar_lea.hbm %s613_s30, 128 }
  0x17   : > { %p412_p3 = scmp.ne.s32.totalorder %s613_s30, %s411_s7  ;;  %p413_p5 = pneg %p619_p0 }
  0x18   : > { %s416_s16 = scalar_lea.hbm %s723_s0, 256  ;;  %p417_p4 = scmp.lt.u32.totalorder %s613_s30, %s723_s0 }
  0x19   : > { %p414_p6 = pnand %p413_p5, %p412_p3  ;;  %p418_p10 = scmp.lt.u32.totalorder %s416_s16, %s411_s7 }
  0x1a   : > { %p420_p12 = scmp.lt.u32.totalorder %s411_s7, %s613_s30 }
  0x1b   : > { %p415_p7 = pneg %p414_p6  ;;  %p419_p13 = por %p418_p10, %p417_p4 }
  0x1d   : > { %p421_p1 = por %p420_p12, %p419_p13 }
  0x1f   : > { %p422_p2 = pnand %p421_p1, %p415_p7 }
  0x21   : > { %425 = shalt.err (!%p422_p2)
}
  0x22   : > { %s426_s20 = scalar_lea.vmem %s615_s4, 128  ;;  %s525_s25 = smov [#allocation2]  }
  0x23   : > { %p427_p3 = scmp.ne.s32.totalorder %s615_s4, %s426_s20  ;;  %s431_s26 = sshll.u32 %s525_s25, 4  ;;  %s432_s26 = int_to_ptr.vmem [resolvable:$false] %s431_s26 }
  0x24   : > { %s433_s27 = scalar_lea.vmem %s432_s26, 256  ;;  %p434_p9 = scmp.lt.s32.totalorder %s615_s4, %s432_s26 }
  0x25   : > { %p429_p6 = pnand %p427_p3, %p413_p5  ;;  %p435_p4 = scmp.lt.s32.totalorder %s433_s27, %s426_s20 }
  0x27   : > { %p430_p11 = pneg %p429_p6  ;;  %p436_p10 = por %p435_p4, %p434_p9 }
  0x29   : > { %p437_p12 = pnand %p436_p10, %p430_p11 }
  0x2b   : > { %440 = shalt.err (!%p437_p12)
}
  0x2c   : > { %349 = dma.hbm_to_vmem [thread:$0]  (!%p619_p0), %s613_s30, 128, %s615_s4, %s129_s6  }
  0x2d   : > { %p732_p1 = scmp.lt.s32.totalorder %s523_s14, 3  ;;  %p733_p2 = scmp.ge.s32.totalorder %s523_s14, 1 }
  0x2f   : > { %p148_p5 = pnand %p733_p2, %p732_p1 }
  0x30   : > { %s655_s28 = sand.u32 (!%p148_p5), 1, %s507_s10  }
  0x31   : > { %151 = sbr.rel (%p148_p5) target bundleno = 205 (0xcd), region = 28  ;;  %s333_s29 = sshll.u32 (!%p148_p5), %s655_s28, 3 }
  0x32   : > { %s154_s3 = scalar_lea.sflag (!%p148_p5), [#allocation3], %s655_s28  ;;  %s157_s5 = scalar_lea.vmem (!%p148_p5), [#allocation2], %s333_s29 }
  0x38   : > { %494 = dma.done.wait (%p591_p8), %s154_s3, 128  }
  0x39   : > { %496 = vsyncadd (%p591_p8), %s154_s3, 4294967168  ;;  %v526_v0 = vmov 0   ;;  %v181_v1 = vld [vmem:[%s724_s1] sm:$0xf]  ;;  %vm186_vm0 = vcmask 1043456   ;;  %v217_v23 = vlaneseq  ;;  %s341_s21 = sshll.u32 %s515_s12, 7 }
  0x3a   : > { %406 = vset.pattern.permute.xlu0 %v526_v0  ;;  %v180_v2 = vld [vmem:[%s157_s5] sm:$0xff]  ;;  %v527_v21 = vmov 839922192   ;;  %s177_s6 = scalar_lea.vmem [#allocation5], %s333_s29  ;;  %s674_s16 = scalar_lea.hbm %s725_s2, %s341_s21 }
  0x3b   : > { %212 = vperm.xlu0 %406, %v181_v1   ;;  %v182_v3 = vmul.f32 %v180_v2, %v180_v2  ;;  %v215_v22 = vunpack.c.l.s4 %v527_v21  ;;  %v218_v27 = vshrl.u32 %v217_v23, 7  ;;  %s241_s7 = sshll.u32 %s177_s6, 4  ;;  %s225_s18 = scalar_lea.sflag [#allocation4], %s655_s28  ;;  %s676_s7 = int_to_ptr.vmem [resolvable:$true] %s241_s7 }
  0x3c   : > { %s441_s19 = scalar_lea.vmem %s676_s7, 128  ;;  %p734_p9 = scmp.ne.s32.totalorder %s729_s22, 0 }
  0x3d   : > { %v184_v4 = vcombine.high %v182_v3, %v182_v3  ;;  %v187_v5 = vsel %vm186_vm0, %v182_v3, 0.0  ;;  %v216_v26 = vunpack.c.0.s8 %v215_v22  ;;  %p442_p8 = scmp.ne.s32.totalorder %s676_s7, %s441_s19  ;;  %s528_s12 = smov [#allocation5]  }
  0x3e   : > { %v188_v7 = vrot.slane %v187_v5, 4  ;;  %s445_s20 = sshll.u32 %s528_s12, 4  ;;  %s446_s20 = int_to_ptr.vmem [resolvable:$false] %s445_s20 }
  0x3f   : > { %v194_v6 = vsel %vm186_vm0, %v184_v4, 0.0  ;;  %v219_v29 = vsub.s32 %v216_v26, %v218_v27  ;;  %p443_p11 = pnand %p442_p8, %p734_p9  ;;  %s447_s25 = scalar_lea.vmem %s446_s20, 256 }
  0x40   : > { %v195_v8 = vrot.slane %v194_v6, 4  ;;  %v189_v9 = vadd.f32 %v188_v7, %v187_v5  ;;  %p448_p7 = scmp.lt.s32.totalorder %s676_s7, %s446_s20  ;;  %p449_p13 = scmp.lt.s32.totalorder %s447_s25, %s441_s19 }
  0x41   : > { %p444_p0 = pneg %p443_p11 }
  0x42   : > { %v196_v10 = vadd.f32 %v195_v8, %v194_v6  ;;  %v190_v11 = vrot.slane %v189_v9, 2  ;;  %p450_p3 = por %p449_p13, %p448_p7 }
  0x44   : > { %v197_v12 = vrot.slane %v196_v10, 2  ;;  %v191_v13 = vadd.f32 %v190_v11, %v189_v9  ;;  %p451_p6 = pnand %p450_p3, %p444_p0 }
  0x46   : > { %v198_v14 = vadd.f32 %v197_v12, %v196_v10  ;;  %v192_v15 = vrot.slane %v191_v13, 1 }
  0x48   : > { %v199_v16 = vrot.slane %v198_v14, 1  ;;  %v193_v17 = vadd.f32 %v192_v15, %v191_v13 }
  0x4a   : > { %v200_v18 = vadd.f32 %v199_v16, %v198_v14  ;;  %v201_v19 = vmax.f32 %v193_v17, 1e-24 }
  0x4c   : > { %v202_v20 = vmax.f32 %v200_v18, 1e-24  ;;  %407 = vrsqrt.f32 %v201_v19 }
  0x4e   : > { %409 = vrsqrt.f32 %v202_v20 }
  0x56   : > { %v408_v24 = vpop.eup %407 }
  0x58   : > { %v410_v25 = vpop.eup %409 }
  0x59   : > { %v207_v28 = vcombine.low %v408_v24, %v410_v25 }
  0x5b   : > { %v209_v30 = vmul.f32 %v207_v28, %v180_v2 }
  0xba   : > { %v213_v31 = vpop.permute.xlu0 %212 }
  0xbb   : > { %v220_v32 = vrot.slane %v213_v31, %v219_v29 }
  0xbd   : > { %v222_v33 = vmul.f32 %v220_v32, %v209_v30 }
  0xbf   : > { %223 = vst [vmem:[%s177_s6] sm:$0xff] %v222_v33 }
  0xc0   : > { %454 = shalt.err (!%p451_p6)
}
  0xc1   : > { %s455_s26 = scalar_lea.hbm %s674_s16, 128  ;;  %s459_s29 = scalar_lea.hbm %s725_s2, 256 }
  0xc2   : > { %p456_p4 = scmp.ne.s32.totalorder %s674_s16, %s455_s26  ;;  %p460_p1 = scmp.lt.u32.totalorder %s674_s16, %s725_s2 }
  0xc3   : > { %p461_p2 = scmp.lt.u32.totalorder %s459_s29, %s455_s26  ;;  %p463_p8 = scmp.lt.u32.totalorder %s455_s26, %s674_s16 }
  0xc4   : > { %p457_p10 = pnand %p456_p4, %p734_p9 }
  0xc5   : > { %p462_p5 = por %p461_p2, %p460_p1 }
  0xc6   : > { %p458_p12 = pneg %p457_p10 }
  0xc7   : > { %p464_p11 = por %p463_p8, %p462_p5 }
  0xc9   : > { %p465_p0 = pnand %p464_p11, %p458_p12 }
  0xcb   : > { %468 = shalt.err (!%p465_p0)
}
  0xcc   : > { %344 = dma.vmem_to_hbm [thread:$0]  (%p734_p9), %s676_s7, 128, %s674_s16, %s225_s18  }
  0xcd PF: > { %s253_s30 = sand.u32 1, %s503_s9   ;;  %p735_p7 = scmp.ne.s32.totalorder %s730_s24, 0 }
  0xce   : > { %p736_p13 = scmp.ge.s32.totalorder %s523_s14, 2  ;;  %s254_s4 = scalar_lea.sflag [#allocation4], %s253_s30 }
  0xd0   : > { %p351_p3 = pnand %p736_p13, %p735_p7 }
  0xd2   : > { %498 = dma.done.wait (!%p351_p3), %s254_s4, 128  }
  0xd3   : > { %500 = vsyncadd (!%p351_p3), %s254_s4, 4294967168  ;;  %s18_s14 = sadd.s32 1, %s523_s14   ;;  %s737_s9 = smov %s507_s10 }
  0xd4   : > { %p15_p6 = scmp.ge.s32.totalorder %s18_s14, 4   ;;  %s738_s10 = smov %s511_s11 }
  0xd5   : > { %s739_s11 = smov %s600_s23  ;;  %s740_s12 = smov %s519_s13 }
  0xd6   : > { %s741_s13 = smov %s743_s17  ;;  %17 = sbr.rel (!%p15_p6) target bundleno = 6 (0x6), region = 73 }
  0xdd   :  { %259 = vsyncpa [#allocation3], 1 }
  0xde   :  { %261 = vsyncpa [#allocation3 + $0x1], 1 }
  0xdf   :  { %262 = vsyncpa [#allocation4], 1 }
  0xe0   :  { %264 = vsyncpa [#allocation4 + $0x1], 1 }

</bundles_post_ra>
